<compile_context>
chip_gen: v7x
topology: tpu7x:2x2x1
jax: 0.10.0
libtpu: 0.0.40
codegen_flags: <defaults>
</compile_context>

<pallas_src>
import numpy as np
import jax
import jax.numpy as jnp
from jax import lax
from jax.experimental import pallas as pl
from jax.experimental.pallas import tpu as pltpu

KERNEL_SIZE = 7


def _band_tap_indices(H, W, K, P):
    """Static (2, HW, HW) int32 map: entry = 1 + flat weight index
    (c*K*K + kh*K + kw) if input position `src` feeds output position `dst`
    through tap (kh, kw) of channel c, else 0 (outside window / zero pad).
    Gathering the flattened conv weights (with a leading 0) through this map
    yields the dense band matrix of the zero-padded KxK cross-correlation."""
    HW = H * W
    T = np.zeros((2, HW, HW), np.int32)
    KK = K * K
    for y in range(H):
        for x in range(W):
            dst = y * W + x
            for kh in range(K):
                sy = y + kh - P
                if sy < 0 or sy >= H:
                    continue
                for kw in range(K):
                    sx = x + kw - P
                    if sx < 0 or sx >= W:
                        continue
                    src = sy * W + sx
                    tap = kh * K + kw
                    T[0, src, dst] = 1 + tap        # 'avg' input channel
                    T[1, src, dst] = 1 + KK + tap   # 'max' input channel
    return T


def _make_sab_kernel(inv_c):
    def kernel(band_ref, x_ref, o_ref, sum_ref, max_ref):
        # band_ref: VMEM (2, HW, HW) dense band matrices (constant across grid)
        # x_ref   : VMEM (NB, CC, HW) lane-dense input block (native NCHW order)
        # o_ref   : VMEM (NB, 1, HW)  sigmoid attention map
        # sum/max : VMEM (NB, HW)     running channel reduction across C-chunks
        c = pl.program_id(1)

        @pl.when(c == 0)
        def _():
            sum_ref[...] = jnp.zeros_like(sum_ref)
            max_ref[...] = jnp.full_like(max_ref, -jnp.inf)

        x = x_ref[...]                                      # (NB, CC, HW)
        sum_ref[...] += jnp.sum(x, axis=1)                  # partial channel sum
        max_ref[...] = jnp.maximum(max_ref[...], jnp.max(x, axis=1))

        @pl.when(c == pl.num_programs(1) - 1)
        def _():
            avg = sum_ref[...] * inv_c                      # (NB, HW)
            mx = max_ref[...]
            # 7x7 "same" conv over [avg, max] as two MXU matmuls against the
            # precomputed band matrices (border zeros baked in).
            acc = (jnp.dot(avg, band_ref[0], preferred_element_type=jnp.float32)
                   + jnp.dot(mx, band_ref[1], preferred_element_type=jnp.float32))
            # exp on the EUP + reciprocal instead of a VALU divide chain.
            sig = pl.reciprocal(1.0 + jnp.exp(-acc), approx=False)
            o_ref[...] = sig[:, None, :].astype(o_ref.dtype)

    return kernel


def _pick_tiles(N, C, HW, itemsize=4):
    """Choose (NB, CC): NB a divisor of N (<=8) with >=2 parallel grid steps
    when N > 1 (v7x megacore), CC a divisor of C keeping the double-buffered
    x block inside a conservative (v7x-safe) VMEM budget."""
    NB = 1
    for d in range(min(N, 8), 0, -1):
        if N % d == 0:
            NB = d
            break
    if N > 1 and N // NB < 2:
        for d in range(NB - 1, 0, -1):
            if N % d == 0 and N // d >= 2:
                NB = d
                break
    x_budget = 24 * 1024 * 1024
    CC = 1
    for d in range(C, 0, -1):
        if C % d == 0 and 2 * NB * d * HW * itemsize <= x_budget:
            CC = d
            break
    return NB, CC


def sab_forward(x, conv_w):
    """x: (N, C, H, W) f32; conv_w: (1, 2, K, K) f32 -> (N, 1, H, W) f32."""
    N, C, H, W = x.shape
    K = conv_w.shape[-1]
    P = K // 2
    HW = H * W
    # TODO(synk): for very large H*W (band matrix 2*HW^2*4 B no longer VMEM
    # friendly, e.g. >= 64x64) fall back to a shifted-tap (pltpu.roll) kernel.

    # Zero-copy view of NCHW with the spatial dims flattened onto the lane axis
    # (no host-side transpose / HBM relayout before the kernel).
    x_flat = x.reshape(N, C, HW)

    # Dense band matrices of the zero-padded 7x7 conv, one (HW, HW) slab per
    # input channel ([avg, max]); border validity is baked in as zeros.
    tap_idx = jnp.asarray(_band_tap_indices(H, W, K, P))             # (2,HW,HW)
    w_pad = jnp.concatenate([jnp.zeros((1,), jnp.float32),
                             conv_w.reshape(-1).astype(jnp.float32)])
    band = w_pad[tap_idx]                                            # (2,HW,HW)

    NB, CC = _pick_tiles(N, C, HW)
    grid = (N // NB, C // CC)

    # VMEM budget from actual block sizes (x, band, out double-buffered) plus
    # scratch and headroom; clamp inside v7x's physical 64 MiB.
    vmem_bytes = (2 * NB * CC * HW * 4          # x double-buffer
                  + 2 * 2 * HW * HW * 4         # band (constant, conservative)
                  + 2 * NB * HW * 4             # out
                  + 2 * NB * HW * 4             # sum/max scratch
                  + (2 << 20))                  # headroom
    vmem_limit = int(min(max(vmem_bytes, 16 << 20), 48 << 20))

    kernel = _make_sab_kernel(1.0 / float(C))

    out = pl.pallas_call(
        kernel,
        out_shape=jax.ShapeDtypeStruct((N, 1, HW), x.dtype),
        grid_spec=pltpu.PrefetchScalarGridSpec(
            num_scalar_prefetch=0,
            grid=grid,
            in_specs=[
                pl.BlockSpec((2, HW, HW), lambda n, c: (0, 0, 0)),    # band
                pl.BlockSpec((NB, CC, HW), lambda n, c: (n, c, 0)),   # x
            ],
            out_specs=pl.BlockSpec((NB, 1, HW), lambda n, c: (n, 0, 0)),
            scratch_shapes=[pltpu.VMEM((NB, HW), jnp.float32),
                            pltpu.VMEM((NB, HW), jnp.float32)],
        ),
        compiler_params=pltpu.CompilerParams(
            dimension_semantics=("parallel", "arbitrary"),
            vmem_limit_bytes=vmem_limit,
        ),
    )(band, x_flat)

    return out.reshape(N, 1, H, W)


def sab_reference(x, conv_w):
    """Plain-JAX reference matching the PyTorch forward."""
    P = conv_w.shape[-1] // 2
    avg = jnp.mean(x, axis=1, keepdims=True)
    mx = jnp.max(x, axis=1, keepdims=True)
    cat = jnp.concatenate([avg, mx], axis=1)                 # (N, 2, H, W)
    y = lax.conv_general_dilated(
        cat, conv_w, window_strides=(1, 1), padding=[(P, P), (P, P)],
        dimension_numbers=("NCHW", "OIHW", "NCHW"))
    return jax.nn.sigmoid(y)


if __name__ == "__main__":
    key = jax.random.PRNGKey(0)
    kx, kw = jax.random.split(key)

    N, C, H, W = 2, 4, 16, 16
    x = jax.random.normal(kx, (N, C, H, W), dtype=jnp.float32)

    # nn.init.normal_(weight, std=0.02), bias=None  (scheme='normal')
    conv_w = 0.02 * jax.random.normal(kw, (1, 2, KERNEL_SIZE, KERNEL_SIZE),
                                      dtype=jnp.float32)

    out = sab_forward(x, conv_w)
    out = jax.block_until_ready(out)

    ref = sab_reference(x, conv_w)
    assert out.shape == (N, 1, H, W)
    np.testing.assert_allclose(np.asarray(out), np.asarray(ref),
                               rtol=1e-5, atol=1e-5)
    print("KERNEL_OK")
</pallas_src>

<mosaic_0001>
module attributes {stable_mosaic.version = 11 : i64} {
  func.func @kernel(%arg0: i32, %arg1: i32, %arg2: memref<2x256x256xf32, #tpu.memory_space<vmem>>, %arg3: memref<1x4x256xf32, #tpu.memory_space<vmem>>, %arg4: memref<1x1x256xf32, #tpu.memory_space<vmem>>, %arg5: memref<1x256xf32, #tpu.memory_space<vmem>>, %arg6: memref<1x256xf32, #tpu.memory_space<vmem>>) attributes {dimension_semantics = [#tpu.dimension_semantics<parallel>, #tpu.dimension_semantics<arbitrary>], iteration_bounds = array<i64: 2, 1>, scalar_prefetch = 0 : i64, scratch_operands = 2 : i64, tpu.core_type = #tpu.core_type<tc>, window_params = [{pipeline_mode = #tpu.pipeline_mode<synchronous>, transform_indices = @transform_0, window_bounds = array<i64: 2, 256, 256>}, {transform_indices = @transform_1, window_bounds = array<i64: 1, 4, 256>}, {transform_indices = @transform_2, window_bounds = array<i64: 1, 1, 256>}]} {
    %c0_i32 = arith.constant 0 : i32
    %0 = arith.cmpi eq, %arg1, %c0_i32 : i32
    %1 = arith.extui %0 : i1 to i32
    %c0_i32_0 = arith.constant 0 : i32
    %2 = arith.cmpi ne, %1, %c0_i32_0 : i32
    scf.if %2 {
      %cst_14 = arith.constant 0.000000e+00 : f32
      %15 = vector.broadcast %cst_14 : f32 to vector<1x256xf32>
      %c0_15 = arith.constant 0 : index
      %c0_16 = arith.constant 0 : index
      %16 = vector.load %arg5[%c0_15, %c0_16] : memref<1x256xf32, #tpu.memory_space<vmem>>, vector<1x256xf32>
      tpu.vector_store %arg5[%c0_15, %c0_16], %15 {strides = array<i32>} : memref<1x256xf32, #tpu.memory_space<vmem>>, vector<1x256xf32>,
      %cst_17 = arith.constant 0xFF800000 : f32
      %17 = vector.broadcast %cst_17 : f32 to vector<1x256xf32>
      %c0_18 = arith.constant 0 : index
      %c0_19 = arith.constant 0 : index
      %18 = vector.load %arg6[%c0_18, %c0_19] : memref<1x256xf32, #tpu.memory_space<vmem>>, vector<1x256xf32>
      tpu.vector_store %arg6[%c0_18, %c0_19], %17 {strides = array<i32>} : memref<1x256xf32, #tpu.memory_space<vmem>>, vector<1x256xf32>,
    } else {
    }
    %c0 = arith.constant 0 : index
    %c0_1 = arith.constant 0 : index
    %c0_2 = arith.constant 0 : index
    %3 = vector.load %arg3[%c0, %c0_1, %c0_2] : memref<1x4x256xf32, #tpu.memory_space<vmem>>, vector<1x4x256xf32>
    %c0_3 = arith.constant 0 : index
    %c0_4 = arith.constant 0 : index
    %4 = vector.load %arg5[%c0_3, %c0_4] : memref<1x256xf32, #tpu.memory_space<vmem>>, vector<1x256xf32>
    %cst = arith.constant dense<0.000000e+00> : vector<1x256xf32>
    %5 = vector.multi_reduction <add>, %3, %cst [1] : vector<1x4x256xf32> to vector<1x256xf32>
    %6 = arith.addf %4, %5 : vector<1x256xf32>
    %c0_5 = arith.constant 0 : index
    %c0_6 = arith.constant 0 : index
    %7 = vector.load %arg5[%c0_5, %c0_6] : memref<1x256xf32, #tpu.memory_space<vmem>>, vector<1x256xf32>
    tpu.vector_store %arg5[%c0_5, %c0_6], %6 {strides = array<i32>} : memref<1x256xf32, #tpu.memory_space<vmem>>, vector<1x256xf32>,
    %c0_7 = arith.constant 0 : index
    %c0_8 = arith.constant 0 : index
    %8 = vector.load %arg6[%c0_7, %c0_8] : memref<1x256xf32, #tpu.memory_space<vmem>>, vector<1x256xf32>
    %cst_9 = arith.constant dense<0xFF800000> : vector<1x256xf32>
    %9 = vector.multi_reduction <maximumf>, %3, %cst_9 [1] : vector<1x4x256xf32> to vector<1x256xf32>
    %10 = arith.maximumf %8, %9 : vector<1x256xf32>
    %c0_10 = arith.constant 0 : index
    %c0_11 = arith.constant 0 : index
    %11 = vector.load %arg6[%c0_10, %c0_11] : memref<1x256xf32, #tpu.memory_space<vmem>>, vector<1x256xf32>
    tpu.vector_store %arg6[%c0_10, %c0_11], %10 {strides = array<i32>} : memref<1x256xf32, #tpu.memory_space<vmem>>, vector<1x256xf32>,
    %c0_i32_12 = arith.constant 0 : i32
    %12 = arith.cmpi eq, %arg1, %c0_i32_12 : i32
    %13 = arith.extui %12 : i1 to i32
    %c0_i32_13 = arith.constant 0 : i32
    %14 = arith.cmpi ne, %13, %c0_i32_13 : i32
    scf.if %14 {
      %c0_14 = arith.constant 0 : index
      %c0_15 = arith.constant 0 : index
      %15 = vector.load %arg5[%c0_14, %c0_15] : memref<1x256xf32, #tpu.memory_space<vmem>>, vector<1x256xf32>
      %cst_16 = arith.constant 2.500000e-01 : f32
      %16 = vector.broadcast %cst_16 : f32 to vector<1x256xf32>
      %17 = arith.mulf %15, %16 : vector<1x256xf32>
      %c0_17 = arith.constant 0 : index
      %c0_18 = arith.constant 0 : index
      %18 = vector.load %arg6[%c0_17, %c0_18] : memref<1x256xf32, #tpu.memory_space<vmem>>, vector<1x256xf32>
      %c0_19 = arith.constant 0 : index
      %c0_20 = arith.constant 0 : index
      %c0_21 = arith.constant 0 : index
      %19 = vector.load %arg2[%c0_19, %c0_20, %c0_21] : memref<2x256x256xf32, #tpu.memory_space<vmem>>, vector<1x256x256xf32>
      %20 = vector.shape_cast %19 : vector<1x256x256xf32> to vector<256x256xf32>
      %cst_22 = arith.constant dense<0.000000e+00> : vector<1x256xf32>
      %21 = tpu.matmul %17, %20, %cst_22 {dimension_numbers = #tpu.dot_dimension_numbers<[1], [0], [0], [1], [0, 0, 1, 1], [], []>} : vector<1x256xf32>, vector<256x256xf32>, vector<1x256xf32> -> vector<1x256xf32>
      %c1 = arith.constant 1 : index
      %c0_23 = arith.constant 0 : index
      %c0_24 = arith.constant 0 : index
      %22 = vector.load %arg2[%c1, %c0_23, %c0_24] : memref<2x256x256xf32, #tpu.memory_space<vmem>>, vector<1x256x256xf32>
      %23 = vector.shape_cast %22 : vector<1x256x256xf32> to vector<256x256xf32>
      %cst_25 = arith.constant dense<0.000000e+00> : vector<1x256xf32>
      %24 = tpu.matmul %18, %23, %cst_25 {dimension_numbers = #tpu.dot_dimension_numbers<[1], [0], [0], [1], [0, 0, 1, 1], [], []>} : vector<1x256xf32>, vector<256x256xf32>, vector<1x256xf32> -> vector<1x256xf32>
      %25 = arith.addf %21, %24 : vector<1x256xf32>
      %cst_26 = arith.constant 0.000000e+00 : f32
      %26 = vector.broadcast %cst_26 : f32 to vector<1x256xf32>
      %27 = arith.subf %26, %25 : vector<1x256xf32>
      %28 = math.exp %27 : vector<1x256xf32>
      %cst_27 = arith.constant 1.000000e+00 : f32
      %29 = vector.broadcast %cst_27 : f32 to vector<1x256xf32>
      %30 = arith.addf %29, %28 : vector<1x256xf32>
      %31 = tpu.reciprocal %30 : vector<1x256xf32> -> vector<1x256xf32>
      %32 = vector.shape_cast %31 : vector<1x256xf32> to vector<1x1x256xf32>
      %c0_28 = arith.constant 0 : index
      %c0_29 = arith.constant 0 : index
      %c0_30 = arith.constant 0 : index
      %33 = vector.load %arg4[%c0_28, %c0_29, %c0_30] : memref<1x1x256xf32, #tpu.memory_space<vmem>>, vector<1x1x256xf32>
      tpu.vector_store %arg4[%c0_28, %c0_29, %c0_30], %32 {strides = array<i32>} : memref<1x1x256xf32, #tpu.memory_space<vmem>>, vector<1x1x256xf32>,
    } else {
    }
    return
  }
  func.func @transform_0(%arg0: i32, %arg1: i32) -> (i32, i32, i32) {
    %c0_i32 = arith.constant 0 : i32
    %c0_i32_0 = arith.constant 0 : i32
    %c0_i32_1 = arith.constant 0 : i32
    %c0_i32_2 = arith.constant 0 : i32
    return %c0_i32, %c0_i32_0, %c0_i32_1 : i32, i32, i32
  }
  func.func @transform_1(%arg0: i32, %arg1: i32) -> (i32, i32, i32) {
    %c0_i32 = arith.constant 0 : i32
    %c0_i32_0 = arith.constant 0 : i32
    return %arg0, %arg1, %c0_i32 : i32, i32, i32
  }
  func.func @transform_2(%arg0: i32, %arg1: i32) -> (i32, i32, i32) {
    %c0_i32 = arith.constant 0 : i32
    %c0_i32_0 = arith.constant 0 : i32
    %c0_i32_1 = arith.constant 0 : i32
    return %arg0, %c0_i32, %c0_i32_0 : i32, i32, i32
  }
}

</mosaic_0001>

<bundles_post_ra>
// kernel: tpu_custom_call.1
= control target key start
LH: loop header
LB: loop body
LE: loop exit
PB: predicated region body
PF: predicated region fallthrough
CT: control target
= control target key end

     0   :  { %7 = vsyncpa [#allocation5], 0  ;;  %s1372_s0 = inlined_call_operand.hbm [shape: f32[2,256,256], index: 0, kind: input, shape index: {}]   ;;  %s1373_s1 = inlined_call_operand.hbm [shape: f32[2,4,256], index: 1, kind: input, shape index: {}]   ;;  %s1374_s2 = inlined_call_operand.hbm [shape: f32[2,1,256], index: 2, kind: output, shape index: {}]  }
   0x1   :  { %8 = vsyncpa [#allocation8], 0 }
   0x2   :  { %10 = vsyncpa [#allocation8 + $0x1], 0 }
   0x3   :  { %11 = vsyncpa [#allocation6], 0 }
   0x4   :  { %13 = vsyncpa [#allocation6 + $0x1], 0  ;;  %s1121_s9 = smov 0   ;;  %s1123_s10 = smov 0  }
   0x5   :  { %s1125_s11 = smov 0   ;;  %s1127_s12 = smov 0  }
   0x6   :  { %s1129_s13 = smov 0   ;;  %s1131_s14 = smov 0  }
   0x7 LB: > { %s716_s15 = sadd.s32 4294967295, %s1096_s14   ;;  %s717_s16 = sadd.s32 4294967294, %s1096_s14   ;;  %s1096_s14 = sphi %s1131_s14, %s19_s14   ;;  %s1092_s13 = sphi %s1129_s13, %s1400_s13   ;;  %s1088_s12 = sphi %s1127_s12, %s1399_s12   ;;  %s1084_s11 = sphi %s1125_s11, %s1398_s11   ;;  %s1080_s10 = sphi %s1123_s10, %s1397_s10   ;;  %s1076_s9 = sphi %s1121_s9, %s1396_s9  }
   0x8   : > { %p74_p0 = scmp.ne.s32.totalorder %s1080_s10, %s1076_s9  ;;  %p1155_p1 = scmp.eq.s32.totalorder %s716_s15, 0 }
   0x9   : > { %p1159_p2 = scmp.eq.s32.totalorder %s716_s15, 1  ;;  %p104_p3 = scmp.eq.s32.totalorder %s717_s16, 1 }
   0xa   : > { %s1379_s17 = scalar_select %p1155_p1, 1, 0 }
   0xb   : > { %s1380_s18 = scalar_select %p1159_p2, 1, 0 }
   0xc   : > { %p1165_p4 = por %p1155_p1, %p74_p0  ;;  %p718_p5 = scmp.ge.s32.totalorder %s1096_s14, 1 }
   0xd   : > { %p1170_p6 = por %p104_p3, %p74_p0  ;;  %p111_p7 = scmp.lt.s32.totalorder %s1096_s14, 3 }
   0xe   : > { %s1381_s19 = scalar_select %p1165_p4, 1, 0 }
   0xf   : > { %s1382_s20 = scalar_select %p1170_p6, 1, 0 }
  0x10   : > { %p1175_p8 = pnand %p718_p5, %p111_p7  ;;  %s1098_s22 = smov [#allocation4]  }
  0x11   : > { %s123_s23 = sshll.u32 %s1098_s22, 4  ;;  %s31_s25 = sadd.s32 1, %s1092_s13  ;;  %s124_s23 = int_to_ptr.vmem [resolvable:$true] %s123_s23 }
  0x12   : > { %s1383_s21 = scalar_select %p1175_p8, 1, 0 }
  0x13   : > { %p873_p9 = pneg %p1175_p8  ;;  %s952_s28 = scalar_lea.hbm %s1372_s0, 16384 }
  0x14   : > { %p953_p12 = scmp.ne.s32.totalorder %s1372_s0, %s952_s28  ;;  %p959_p5 = scmp.lt.u32.totalorder %s952_s28, %s1372_s0 }
  0x15   : > { %p1184_p11 = pnand %p873_p9, %p1155_p1 }
  0x17   : > { %p954_p13 = pneg %p1184_p11 }
  0x19   : > { %p955_p0 = pnand %p954_p13, %p953_p12 }
  0x1b   : > { %p956_p3 = pneg %p955_p0 }
  0x1d   : > { %p961_p7 = pnand %p959_p5, %p956_p3 }
  0x1f   : > { %964 = shalt.err (!%p961_p7)
}
  0x20   : > { %s965_s5 = scalar_lea.vmem %s124_s23, 16384  ;;  %p973_p4 = scmp.lt.s32.totalorder %s124_s23, %s124_s23 }
  0x21   : > { %p966_p9 = scmp.ne.s32.totalorder %s124_s23, %s965_s5  ;;  %p974_p1 = scmp.lt.s32.totalorder %s965_s5, %s965_s5 }
  0x23   : > { %p968_p10 = pnand %p966_p9, %p954_p13  ;;  %p975_p8 = por %p974_p1, %p973_p4 }
  0x25   : > { %p969_p6 = pneg %p968_p10 }
  0x27   : > { %p976_p2 = pnand %p975_p8, %p969_p6 }
  0x29   : > { %979 = shalt.err (!%p976_p2)
}
  0x2a   : > { %s1099_s6 = smov 256   ;;  %s1100_s7 = smov 16  }
  0x2b   : > { %876 = dma.hbm_to_vmem [thread:$0]  (!%p1184_p11), %s1372_s0, 16384, %s124_s23, [#allocation5], %s1099_s6, %s1099_s6, %s1100_s7  }
  0x2c   : > { %p33_p1 = scmp.ge.s32.totalorder %s31_s25, 2  ;;  %s61_s16 = sadd.s32 1, %s1084_s11 }
  0x2d   : > { %p68_p2 = scmp.ne.s32.totalorder %s1084_s11, %s1080_s10  ;;  %p69_p4 = scmp.eq.s32.totalorder %s1096_s14, 0 }
  0x2e   : > { %s1402_s25 = smov (%p33_p1, %s31_s25), 0  ;;  %p1386_p8 = scmp.ne.s32.totalorder %s1380_s18, 0 }
  0x2f   : > { %p1211_p6 = por %p69_p4, %p68_p2  ;;  %s56_s24 = ssub.s32 %s1092_s13, %s1402_s25 }
  0x30   : > { %p1217_p10 = por %p1386_p8, %p68_p2  ;;  %p886_p12 = scmp.lt.s32.totalorder %s1096_s14, 2 }
  0x31   : > { %p59_p11 = scmp.eq.s32.totalorder %s56_s24, 0  ;;  %s137_s23 = sand.u32 1, %s1084_s11  }
  0x32   : > { %s721_s27 = sshll.u32 %s137_s23, 3  ;;  %s733_s29 = sshll.u32 %s1092_s13, 7 }
  0x33   : > { %s1226_s28 = scalar_select %p59_p11, %s1084_s11, %s61_s16  }
  0x34   : > { %s1232_s4 = scalar_lea.hbm %s1373_s1, %s733_s29  ;;  %s141_s18 = scalar_lea.vmem [#allocation7], %s721_s27 }
  0x35   : > { %s151_s5 = sshll.u32 %s141_s18, 4  ;;  %p1238_p13 = pnand %p886_p12, %p1211_p6  ;;  %s1234_s5 = int_to_ptr.vmem [resolvable:$true] %s151_s5 }
  0x36   : > { %s138_s7 = scalar_lea.sflag [#allocation8], %s137_s23  ;;  %s980_s8 = scalar_lea.hbm %s1232_s4, 128 }
  0x37   : > { %p981_p0 = scmp.ne.s32.totalorder %s1232_s4, %s980_s8  ;;  %p982_p3 = pneg %p1238_p13 }
  0x38   : > { %s985_s24 = scalar_lea.hbm %s1373_s1, 256  ;;  %p986_p9 = scmp.lt.u32.totalorder %s1232_s4, %s1373_s1 }
  0x39   : > { %p983_p5 = pnand %p982_p3, %p981_p0  ;;  %p987_p1 = scmp.lt.u32.totalorder %s985_s24, %s980_s8 }
  0x3a   : > { %p989_p4 = scmp.lt.u32.totalorder %s980_s8, %s1232_s4 }
  0x3b   : > { %p984_p7 = pneg %p983_p5  ;;  %p988_p2 = por %p987_p1, %p986_p9 }
  0x3d   : > { %p990_p6 = por %p989_p4, %p988_p2 }
  0x3f   : > { %p991_p8 = pnand %p990_p6, %p984_p7 }
  0x41   : > { %994 = shalt.err (!%p991_p8)
}
  0x42   : > { %s995_s23 = scalar_lea.vmem %s1234_s5, 128  ;;  %s1101_s29 = smov [#allocation7]  }
  0x43   : > { %p996_p12 = scmp.ne.s32.totalorder %s1234_s5, %s995_s23  ;;  %s1000_s30 = sshll.u32 %s1101_s29, 4  ;;  %s1001_s30 = int_to_ptr.vmem [resolvable:$false] %s1000_s30 }
  0x44   : > { %s1002_s3 = scalar_lea.vmem %s1001_s30, 256  ;;  %p1003_p5 = scmp.lt.s32.totalorder %s1234_s5, %s1001_s30 }
  0x45   : > { %p998_p11 = pnand %p996_p12, %p982_p3  ;;  %p1004_p9 = scmp.lt.s32.totalorder %s1002_s3, %s995_s23 }
  0x47   : > { %p999_p0 = pneg %p998_p11  ;;  %p1005_p1 = por %p1004_p9, %p1003_p5 }
  0x49   : > { %p1006_p2 = pnand %p1005_p1, %p999_p0 }
  0x4b   : > { %1009 = shalt.err (!%p1006_p2)
}
  0x4c   : > { %880 = dma.hbm_to_vmem [thread:$0]  (!%p1238_p13), %s1232_s4, 128, %s1234_s5, %s138_s7  }
  0x4d   : > { %p1389_p7 = scmp.ne.s32.totalorder %s1383_s21, 0 }
  0x4e   : > { %p1390_p3 = scmp.ne.s32.totalorder (!%p1389_p7), %s1379_s17, 0 }
  0x4f   : > { %160 = sbr.rel (%p1389_p7) target bundleno = 426 (0x1aa), region = 28 }
  0x56   : > { %1063 = dma.done.wait (%p1390_p3), [#allocation5], 16384  }
  0x57   : > { %1065 = vsyncadd (%p1390_p3), [#allocation5], 4294950912  ;;  %s1274_s18 = sand.u32 1, %s1080_s10   ;;  %p1391_p13 = scmp.ne.s32.totalorder %s1381_s19, 0 }
  0x58   : > { %s726_s8 = sshll.u32 %s1274_s18, 3  ;;  %s167_s6 = scalar_lea.sflag [#allocation8], %s1274_s18 }
  0x59   : > { %s1278_s15 = scalar_lea.vmem [#allocation7], %s726_s8 }
  0x5a   : > { %1067 = dma.done.wait (%p1391_p13), %s167_s6, 128  }
  0x5b   : > { %1069 = vsyncadd (%p1391_p13), %s167_s6, 4294967168  ;;  %v195_v0 = vlaneseq  ;;  %v1102_v2 = vmov 0.0   ;;  %v1103_v3 = vmov -inf   ;;  %v352_v4 = vld [vmem:[#allocation4 + $0x208] sm:$0xff]  ;;  %v354_v5 = vld [vmem:[#allocation4 + $0x218] sm:$0xff]  ;;  %vm206_vm1 = vcmask 1043456  }
  0x5c   : > { %v287_v6 = vld [vmem:[#allocation4 + $0x8] sm:$0xff]  ;;  %v735_v7 = vpack.c.bf16 %v354_v5, %v352_v4  ;;  %v289_v8 = vld [vmem:[#allocation4 + $0x18] sm:$0xff]  ;;  %v351_v9 = vld [vmem:[#allocation4 + $0x200] sm:$0xff]  ;;  %s727_s17 = sshll.u32 %s1274_s18, 1  ;;  %s734_s19 = sshll.u32 %s1088_s12, 5 }
  0x5d   : > { %vm1285_vm0 = vcmp.lt.s32.totalorder %v195_v0, 256  ;;  %v353_v10 = vld [vmem:[#allocation4 + $0x210] sm:$0xff]  ;;  %v799_v11 = vpack.c.bf16 %v289_v8, %v287_v6  ;;  %v286_v13 = vld [vmem:[#allocation4] sm:$0xff]  ;;  %v356_v15 = vld [vmem:[#allocation4 + $0x228] sm:$0xff]  ;;  %s190_s21 = scalar_lea.vmem [#allocation9], %s727_s17  ;;  %s1321_s16 = scalar_lea.hbm %s1374_s2, %s734_s19 }
  0x5e   : > { %199 = vst.msk [vmem:[#allocation2] sm:$0x3] %vm1285_vm0, %v1102_v2  ;;  %200 = vst.msk [vmem:[#allocation3] sm:$0x3] %vm1285_vm0, %v1103_v3  ;;  %v737_v12 = vpack.c.bf16 %v353_v10, %v351_v9  ;;  %v288_v14 = vld [vmem:[#allocation4 + $0x10] sm:$0xff]  ;;  %736 = vmatprep.subr.bf16.mxu1 %v735_v7  ;;  %v358_v17 = vld [vmem:[#allocation4 + $0x238] sm:$0xff] }
  0x5f   : > { %v801_v16 = vpack.c.bf16 %v288_v14, %v286_v13  ;;  %v291_v18 = vld [vmem:[#allocation4 + $0x28] sm:$0xff]  ;;  %v293_v19 = vld [vmem:[#allocation4 + $0x38] sm:$0xff]  ;;  %800 = vmatprep.subr.bf16.mxu0 %v799_v11  ;;  %v739_v20 = vpack.c.bf16 %v358_v17, %v356_v15  ;;  %v355_v22 = vld [vmem:[#allocation4 + $0x220] sm:$0xff]  ;;  %s623_s4 = sshll.u32 %s190_s21, 4  ;;  %s609_s12 = scalar_lea.sflag [#allocation6], %s1274_s18  ;;  %s1323_s4 = int_to_ptr.vmem [resolvable:$true] %s623_s4 }
  0x60   : > { %738 = vmatpush1.bf16.msra.mxu1 %v737_v12  ;;  %v803_v21 = vpack.c.bf16 %v293_v19, %v291_v18  ;;  %v357_v23 = vld [vmem:[#allocation4 + $0x230] sm:$0xff]  ;;  %v290_v24 = vld [vmem:[#allocation4 + $0x20] sm:$0xff]  ;;  %v360_v27 = vld [vmem:[#allocation4 + $0x248] sm:$0xff]  ;;  %s1010_s24 = scalar_lea.vmem %s1323_s4, 32  ;;  %s1105_s22 = smov [#allocation9]  }
  0x61   : > { %802 = vmatpush1.bf16.msra.mxu0 %v801_v16  ;;  %v741_v25 = vpack.c.bf16 %v357_v23, %v355_v22  ;;  %v292_v26 = vld [vmem:[#allocation4 + $0x30] sm:$0xff]  ;;  %v362_v28 = vld [vmem:[#allocation4 + $0x258] sm:$0xff]  ;;  %740 = vmatprep.subr.bf16.mxu1 %v739_v20  ;;  %v295_v31 = vld [vmem:[#allocation4 + $0x48] sm:$0xff]  ;;  %p1011_p4 = scmp.ne.s32.totalorder %s1323_s4, %s1010_s24  ;;  %s1014_s27 = sshll.u32 %s1105_s22, 4  ;;  %s1015_s27 = int_to_ptr.vmem [resolvable:$false] %s1014_s27 }
  0x62   : > { %804 = vmatprep.subr.bf16.mxu0 %v803_v21  ;;  %v805_v29 = vpack.c.bf16 %v292_v26, %v290_v24  ;;  %v743_v30 = vpack.c.bf16 %v362_v28, %v360_v27  ;;  %v297_v32 = vld [vmem:[#allocation4 + $0x58] sm:$0xff]  ;;  %v359_v33 = vld [vmem:[#allocation4 + $0x240] sm:$0xff]  ;;  %v361_v35 = vld [vmem:[#allocation4 + $0x250] sm:$0xff]  ;;  %s1016_s23 = scalar_lea.vmem %s1015_s27, 64  ;;  %p1017_p12 = scmp.lt.s32.totalorder %s1323_s4, %s1015_s27 }
  0x63   : > { %v807_v34 = vpack.c.bf16 %v297_v32, %v295_v31  ;;  %v294_v36 = vld [vmem:[#allocation4 + $0x40] sm:$0xff]  ;;  %v296_v37 = vld [vmem:[#allocation4 + $0x50] sm:$0xff]  ;;  %v745_v38 = vpack.c.bf16 %v361_v35, %v359_v33  ;;  %v364_v39 = vld [vmem:[#allocation4 + $0x268] sm:$0xff]  ;;  %p1012_p6 = pnand %p1011_p4, %p1217_p10  ;;  %p1018_p11 = scmp.lt.s32.totalorder %s1016_s23, %s1010_s24 }
  0x64   : > { %742 = vmatpush1.bf16.msra.mxu1 %v741_v25  ;;  %v366_v40 = vld [vmem:[#allocation4 + $0x278] sm:$0xff]  ;;  %v299_v41 = vld [vmem:[#allocation4 + $0x68] sm:$0xff]  ;;  %v809_v42 = vpack.c.bf16 %v296_v37, %v294_v36  ;;  %v363_v45 = vld [vmem:[#allocation4 + $0x260] sm:$0xff] }
  0x65   : > { %806 = vmatpush1.bf16.msra.mxu0 %v805_v29  ;;  %744 = vmatprep.subr.bf16.mxu1 %v743_v30  ;;  %v747_v43 = vpack.c.bf16 %v366_v40, %v364_v39  ;;  %v301_v44 = vld [vmem:[#allocation4 + $0x78] sm:$0xff]  ;;  %v365_v46 = vld [vmem:[#allocation4 + $0x270] sm:$0xff]  ;;  %v298_v48 = vld [vmem:[#allocation4 + $0x60] sm:$0xff]  ;;  %p1013_p8 = pneg %p1012_p6  ;;  %p1019_p0 = por %p1018_p11, %p1017_p12 }
  0x66   : > { %808 = vmatprep.subr.bf16.mxu0 %v807_v34  ;;  %v811_v47 = vpack.c.bf16 %v301_v44, %v299_v41  ;;  %v300_v49 = vld [vmem:[#allocation4 + $0x70] sm:$0xff]  ;;  %v368_v50 = vld [vmem:[#allocation4 + $0x288] sm:$0xff]  ;;  %v370_v51 = vld [vmem:[#allocation4 + $0x298] sm:$0xff]  ;;  %v749_v54 = vpack.c.bf16 %v365_v46, %v363_v45 }
  0x67   : > { %v303_v52 = vld [vmem:[#allocation4 + $0x88] sm:$0xff]  ;;  %v305_v53 = vld [vmem:[#allocation4 + $0x98] sm:$0xff]  ;;  %v813_v55 = vpack.c.bf16 %v300_v49, %v298_v48  ;;  %v751_v56 = vpack.c.bf16 %v370_v51, %v368_v50  ;;  %v367_v57 = vld [vmem:[#allocation4 + $0x280] sm:$0xff]  ;;  %p1020_p5 = pnand %p1019_p0, %p1013_p8 }
  0x68   : > { %746 = vmatpush1.bf16.msra.mxu1 %v745_v38  ;;  %v369_v58 = vld [vmem:[#allocation4 + $0x290] sm:$0xff]  ;;  %v302_v59 = vld [vmem:[#allocation4 + $0x80] sm:$0xff]  ;;  %v815_v60 = vpack.c.bf16 %v305_v53, %v303_v52  ;;  %v372_v62 = vld [vmem:[#allocation4 + $0x2a8] sm:$0xff] }
  0x69   : > { %810 = vmatpush1.bf16.msra.mxu0 %v809_v42  ;;  %748 = vmatprep.subr.bf16.mxu1 %v747_v43  ;;  %v304_v61 = vld [vmem:[#allocation4 + $0x90] sm:$0xff]  ;;  %v374_v63 = vld [vmem:[#allocation4 + $0x2b8] sm:$0xff]  ;;  %v307_v2 = vld [vmem:[#allocation4 + $0xa8] sm:$0xff]  ;;  %v753_v4 = vpack.c.bf16 %v369_v58, %v367_v57 }
  0x6a   : > { %812 = vmatprep.subr.bf16.mxu0 %v811_v47  ;;  %v309_v3 = vld [vmem:[#allocation4 + $0xb8] sm:$0xff]  ;;  %v817_v5 = vpack.c.bf16 %v304_v61, %v302_v59  ;;  %v755_v6 = vpack.c.bf16 %v374_v63, %v372_v62  ;;  %v371_v7 = vld [vmem:[#allocation4 + $0x2a0] sm:$0xff]  ;;  %v373_v8 = vld [vmem:[#allocation4 + $0x2b0] sm:$0xff] }
  0x6b   : > { %v306_v9 = vld [vmem:[#allocation4 + $0xa0] sm:$0xff]  ;;  %v819_v10 = vpack.c.bf16 %v309_v3, %v307_v2  ;;  %v308_v11 = vld [vmem:[#allocation4 + $0xb0] sm:$0xff]  ;;  %v376_v12 = vld [vmem:[#allocation4 + $0x2c8] sm:$0xff]  ;;  %v757_v16 = vpack.c.bf16 %v373_v8, %v371_v7 }
  0x6c   : > { %750 = vmatpush1.bf16.msra.mxu1 %v749_v54  ;;  %v378_v13 = vld [vmem:[#allocation4 + $0x2d8] sm:$0xff]  ;;  %v311_v14 = vld [vmem:[#allocation4 + $0xc8] sm:$0xff]  ;;  %v821_v17 = vpack.c.bf16 %v308_v11, %v306_v9  ;;  %v375_v19 = vld [vmem:[#allocation4 + $0x2c0] sm:$0xff] }
  0x6d   : > { %814 = vmatpush1.bf16.msra.mxu0 %v813_v55  ;;  %752 = vmatprep.subr.bf16.mxu1 %v751_v56  ;;  %v313_v15 = vld [vmem:[#allocation4 + $0xd8] sm:$0xff]  ;;  %v759_v18 = vpack.c.bf16 %v378_v13, %v376_v12  ;;  %v377_v20 = vld [vmem:[#allocation4 + $0x2d0] sm:$0xff]  ;;  %v310_v21 = vld [vmem:[#allocation4 + $0xc0] sm:$0xff] }
  0x6e   : > { %816 = vmatprep.subr.bf16.mxu0 %v815_v60  ;;  %v823_v22 = vpack.c.bf16 %v313_v15, %v311_v14  ;;  %v312_v23 = vld [vmem:[#allocation4 + $0xd0] sm:$0xff]  ;;  %v380_v24 = vld [vmem:[#allocation4 + $0x2e8] sm:$0xff]  ;;  %v382_v25 = vld [vmem:[#allocation4 + $0x2f8] sm:$0xff]  ;;  %v761_v28 = vpack.c.bf16 %v377_v20, %v375_v19 }
  0x6f   : > { %v315_v26 = vld [vmem:[#allocation4 + $0xe8] sm:$0xff]  ;;  %v317_v27 = vld [vmem:[#allocation4 + $0xf8] sm:$0xff]  ;;  %v825_v29 = vpack.c.bf16 %v312_v23, %v310_v21  ;;  %v763_v30 = vpack.c.bf16 %v382_v25, %v380_v24  ;;  %v379_v31 = vld [vmem:[#allocation4 + $0x2e0] sm:$0xff] }
  0x70   : > { %754 = vmatpush1.bf16.msra.mxu1 %v753_v4  ;;  %v381_v32 = vld [vmem:[#allocation4 + $0x2f0] sm:$0xff]  ;;  %v314_v33 = vld [vmem:[#allocation4 + $0xe0] sm:$0xff]  ;;  %v827_v34 = vpack.c.bf16 %v317_v27, %v315_v26  ;;  %v384_v36 = vld [vmem:[#allocation4 + $0x308] sm:$0xff] }
  0x71   : > { %818 = vmatpush1.bf16.msra.mxu0 %v817_v5  ;;  %756 = vmatprep.subr.bf16.mxu1 %v755_v6  ;;  %v316_v35 = vld [vmem:[#allocation4 + $0xf0] sm:$0xff]  ;;  %v386_v37 = vld [vmem:[#allocation4 + $0x318] sm:$0xff]  ;;  %v319_v38 = vld [vmem:[#allocation4 + $0x108] sm:$0xff]  ;;  %v765_v40 = vpack.c.bf16 %v381_v32, %v379_v31 }
  0x72   : > { %820 = vmatprep.subr.bf16.mxu0 %v819_v10  ;;  %v321_v39 = vld [vmem:[#allocation4 + $0x118] sm:$0xff]  ;;  %v829_v41 = vpack.c.bf16 %v316_v35, %v314_v33  ;;  %v767_v42 = vpack.c.bf16 %v386_v37, %v384_v36  ;;  %v383_v43 = vld [vmem:[#allocation4 + $0x300] sm:$0xff]  ;;  %v385_v44 = vld [vmem:[#allocation4 + $0x310] sm:$0xff] }
  0x73   : > { %v318_v45 = vld [vmem:[#allocation4 + $0x100] sm:$0xff]  ;;  %v831_v46 = vpack.c.bf16 %v321_v39, %v319_v38  ;;  %v320_v47 = vld [vmem:[#allocation4 + $0x110] sm:$0xff]  ;;  %v388_v48 = vld [vmem:[#allocation4 + $0x328] sm:$0xff]  ;;  %v769_v52 = vpack.c.bf16 %v385_v44, %v383_v43 }
  0x74   : > { %758 = vmatpush1.bf16.msra.mxu1 %v757_v16  ;;  %v390_v49 = vld [vmem:[#allocation4 + $0x338] sm:$0xff]  ;;  %v323_v50 = vld [vmem:[#allocation4 + $0x128] sm:$0xff]  ;;  %v833_v53 = vpack.c.bf16 %v320_v47, %v318_v45  ;;  %v387_v55 = vld [vmem:[#allocation4 + $0x320] sm:$0xff] }
  0x75   : > { %822 = vmatpush1.bf16.msra.mxu0 %v821_v17  ;;  %760 = vmatprep.subr.bf16.mxu1 %v759_v18  ;;  %v325_v51 = vld [vmem:[#allocation4 + $0x138] sm:$0xff]  ;;  %v771_v54 = vpack.c.bf16 %v390_v49, %v388_v48  ;;  %v389_v56 = vld [vmem:[#allocation4 + $0x330] sm:$0xff]  ;;  %v322_v57 = vld [vmem:[#allocation4 + $0x120] sm:$0xff] }
  0x76   : > { %824 = vmatprep.subr.bf16.mxu0 %v823_v22  ;;  %v835_v58 = vpack.c.bf16 %v325_v51, %v323_v50  ;;  %v324_v59 = vld [vmem:[#allocation4 + $0x130] sm:$0xff]  ;;  %v392_v60 = vld [vmem:[#allocation4 + $0x348] sm:$0xff]  ;;  %v394_v61 = vld [vmem:[#allocation4 + $0x358] sm:$0xff]  ;;  %v773_v2 = vpack.c.bf16 %v389_v56, %v387_v55  ;;  %v1104_v51 = vmov 1966171168  }
  0x77   : > { %v327_v62 = vld [vmem:[#allocation4 + $0x148] sm:$0xff]  ;;  %v329_v63 = vld [vmem:[#allocation4 + $0x158] sm:$0xff]  ;;  %v837_v3 = vpack.c.bf16 %v324_v59, %v322_v57  ;;  %v775_v4 = vpack.c.bf16 %v394_v61, %v392_v60  ;;  %v391_v5 = vld [vmem:[#allocation4 + $0x340] sm:$0xff] }
  0x78   : > { %762 = vmatpush1.bf16.msra.mxu1 %v761_v28  ;;  %v393_v6 = vld [vmem:[#allocation4 + $0x350] sm:$0xff]  ;;  %v326_v7 = vld [vmem:[#allocation4 + $0x140] sm:$0xff]  ;;  %v839_v8 = vpack.c.bf16 %v329_v63, %v327_v62  ;;  %v396_v10 = vld [vmem:[#allocation4 + $0x368] sm:$0xff] }
  0x79   : > { %826 = vmatpush1.bf16.msra.mxu0 %v825_v29  ;;  %764 = vmatprep.subr.bf16.mxu1 %v763_v30  ;;  %v328_v9 = vld [vmem:[#allocation4 + $0x150] sm:$0xff]  ;;  %v398_v11 = vld [vmem:[#allocation4 + $0x378] sm:$0xff]  ;;  %v331_v12 = vld [vmem:[#allocation4 + $0x168] sm:$0xff]  ;;  %v777_v14 = vpack.c.bf16 %v393_v6, %v391_v5 }
  0x7a   : > { %828 = vmatprep.subr.bf16.mxu0 %v827_v34  ;;  %v333_v13 = vld [vmem:[#allocation4 + $0x178] sm:$0xff]  ;;  %v395_v15 = vld [vmem:[#allocation4 + $0x360] sm:$0xff]  ;;  %v397_v16 = vld [vmem:[#allocation4 + $0x370] sm:$0xff]  ;;  %v841_v18 = vpack.c.bf16 %v328_v9, %v326_v7  ;;  %v779_v19 = vpack.c.bf16 %v398_v11, %v396_v10 }
  0x7b   : > { %v330_v17 = vld [vmem:[#allocation4 + $0x160] sm:$0xff]  ;;  %v332_v20 = vld [vmem:[#allocation4 + $0x170] sm:$0xff]  ;;  %v400_v21 = vld [vmem:[#allocation4 + $0x388] sm:$0xff]  ;;  %v843_v23 = vpack.c.bf16 %v333_v13, %v331_v12  ;;  %v781_v30 = vpack.c.bf16 %v397_v16, %v395_v15  ;;  %v1299_v12 = vshrl.u32 %v195_v0, 7 }
  0x7c   : > { %766 = vmatpush1.bf16.msra.mxu1 %v765_v40  ;;  %v402_v22 = vld [vmem:[#allocation4 + $0x398] sm:$0xff]  ;;  %v335_v24 = vld [vmem:[#allocation4 + $0x188] sm:$0xff]  ;;  %v845_v31 = vpack.c.bf16 %v332_v20, %v330_v17  ;;  %v399_v32 = vld [vmem:[#allocation4 + $0x380] sm:$0xff] }
  0x7d   : > { %830 = vmatpush1.bf16.msra.mxu0 %v829_v41  ;;  %768 = vmatprep.subr.bf16.mxu1 %v767_v42  ;;  %v337_v25 = vld [vmem:[#allocation4 + $0x198] sm:$0xff]  ;;  %v201_v26 = vld [vmem:[%s1278_s15] sm:$0xff]  ;;  %v401_v33 = vld [vmem:[#allocation4 + $0x390] sm:$0xff]  ;;  %v783_v36 = vpack.c.bf16 %v402_v22, %v400_v21 }
  0x7e   : > { %832 = vmatprep.subr.bf16.mxu0 %v831_v46  ;;  %v204_v27 = vcombine.high %v201_v26, %v201_v26  ;;  %v207_v28 = vsel %vm206_vm1, %v201_v26, 0.0  ;;  %v246_v29 = vsel %vm206_vm1, %v201_v26, -inf  ;;  %v847_v37 = vpack.c.bf16 %v337_v25, %v335_v24  ;;  %v334_v38 = vld [vmem:[#allocation4 + $0x180] sm:$0xff]  ;;  %v336_v39 = vld [vmem:[#allocation4 + $0x190] sm:$0xff]  ;;  %v404_v40 = vld [vmem:[#allocation4 + $0x3a8] sm:$0xff] }
  0x7f   : > { %v208_v34 = vrot.slane %v207_v28, 4  ;;  %v247_v35 = vrot.slane %v246_v29, 4  ;;  %v406_v43 = vld [vmem:[#allocation4 + $0x3b8] sm:$0xff]  ;;  %v339_v44 = vld [vmem:[#allocation4 + $0x1a8] sm:$0xff]  ;;  %v785_v50 = vpack.c.bf16 %v401_v33, %v399_v32  ;;  %v849_v59 = vpack.c.bf16 %v336_v39, %v334_v38  ;;  %v338_v62 = vld [vmem:[#allocation4 + $0x1a0] sm:$0xff] }
  0x80   : > { %770 = vmatpush1.bf16.msra.mxu1 %v769_v52  ;;  %v214_v41 = vsel %vm206_vm1, %v204_v27, 0.0  ;;  %v253_v42 = vsel %vm206_vm1, %v204_v27, -inf  ;;  %v341_v45 = vld [vmem:[#allocation4 + $0x1b8] sm:$0xff]  ;;  %v225_v52 = vunpack.c.l.s4 %v1104_v51  ;;  %v787_v60 = vpack.c.bf16 %v406_v43, %v404_v40  ;;  %v340_v63 = vld [vmem:[#allocation4 + $0x1b0] sm:$0xff]  ;;  %v407_v20 = vld [vmem:[#allocation4 + $0x3c0] sm:$0xff] }
  0x81   : > { %834 = vmatpush1.bf16.msra.mxu0 %v833_v53  ;;  %772 = vmatprep.subr.bf16.mxu1 %v771_v54  ;;  %v209_v46 = vadd.f32 %v208_v34, %v207_v28  ;;  %v215_v47 = vrot.slane %v214_v41, 4  ;;  %v248_v48 = vmax.f32 %v246_v29, %v247_v35  ;;  %v254_v49 = vrot.slane %v253_v42, 4  ;;  %v403_v53 = vld [vmem:[#allocation4 + $0x3a0] sm:$0xff]  ;;  %v405_v54 = vld [vmem:[#allocation4 + $0x3b0] sm:$0xff]  ;;  %v345_v5 = vld [vmem:[#allocation4 + $0x1d8] sm:$0xff] }
  0x82   : > { %836 = vmatprep.subr.bf16.mxu0 %v835_v58  ;;  %v851_v61 = vpack.c.bf16 %v341_v45, %v339_v44  ;;  %v789_v10 = vpack.c.bf16 %v405_v54, %v403_v53  ;;  %v226_v11 = vunpack.c.0.s8 %v225_v52  ;;  %v853_v17 = vpack.c.bf16 %v340_v63, %v338_v62  ;;  %v409_v21 = vld [vmem:[#allocation4 + $0x3d0] sm:$0xff]  ;;  %v342_v22 = vld [vmem:[#allocation4 + $0x1c0] sm:$0xff]  ;;  %v412_v24 = vld [vmem:[#allocation4 + $0x3e8] sm:$0xff] }
  0x83   : > { %v210_v55 = vrot.slane %v209_v46, 2  ;;  %v216_v56 = vadd.f32 %v215_v47, %v214_v41  ;;  %v249_v57 = vrot.slane %v248_v48, 2  ;;  %v255_v58 = vmax.f32 %v253_v42, %v254_v49  ;;  %v414_v25 = vld [vmem:[#allocation4 + $0x3f8] sm:$0xff]  ;;  %v347_v29 = vld [vmem:[#allocation4 + $0x1e8] sm:$0xff]  ;;  %v413_v38 = vld [vmem:[#allocation4 + $0x3f0] sm:$0xff] }
  0x84   : > { %774 = vmatpush1.bf16.msra.mxu1 %v773_v2  ;;  %v408_v2 = vld [vmem:[#allocation4 + $0x3c8] sm:$0xff]  ;;  %v1302_v33 = vsub.s32 %v226_v11, %v1299_v12  ;;  %v346_v40 = vld [vmem:[#allocation4 + $0x1e0] sm:$0xff]  ;;  %v348_v41 = vld [vmem:[#allocation4 + $0x1f0] sm:$0xff]  ;;  %v418_v54 = vsub.s32 0, %v1299_v12 }
  0x85   : > { %838 = vmatpush1.bf16.msra.mxu0 %v837_v3  ;;  %776 = vmatprep.subr.bf16.mxu1 %v775_v4  ;;  %v410_v3 = vld [vmem:[#allocation4 + $0x3d8] sm:$0xff]  ;;  %v343_v4 = vld [vmem:[#allocation4 + $0x1c8] sm:$0xff]  ;;  %v211_v6 = vadd.f32 %v210_v55, %v209_v46  ;;  %v217_v7 = vrot.slane %v216_v56, 2  ;;  %v256_v9 = vrot.slane %v255_v58, 2  ;;  %v861_v47 = vpack.c.bf16 %v348_v41, %v346_v40 }
  0x86   : > { %840 = vmatprep.subr.bf16.mxu0 %v839_v8  ;;  %v250_v8 = vmax.f32 %v248_v48, %v249_v57  ;;  %v202_v48 = vld [vmem:[#allocation2] sm:$0x3]  ;;  %v245_v49 = vld [vmem:[#allocation3] sm:$0x3]  ;;  %v422_v55 = vsub.s32 1, %v1299_v12 }
  0x87   : > { %v212_v13 = vrot.slane %v211_v6, 1  ;;  %v257_v16 = vmax.f32 %v255_v58, %v256_v9 }
  0x88   : > { %778 = vmatpush1.bf16.msra.mxu1 %v777_v14  ;;  %v218_v14 = vadd.f32 %v217_v7, %v216_v56  ;;  %v251_v15 = vrot.slane %v250_v8, 1 }
  0x89   : > { %842 = vmatpush1.bf16.msra.mxu0 %v841_v18  ;;  %780 = vmatprep.subr.bf16.mxu1 %v779_v19  ;;  %v791_v18 = vpack.c.bf16 %v410_v3, %v408_v2  ;;  %v855_v19 = vpack.c.bf16 %v345_v5, %v343_v4  ;;  %v213_v26 = vadd.f32 %v212_v13, %v211_v6  ;;  %v258_v28 = vrot.slane %v257_v16, 1 }
  0x8a   : > { %844 = vmatprep.subr.bf16.mxu0 %v843_v23  ;;  %v344_v23 = vld [vmem:[#allocation4 + $0x1d0] sm:$0xff]  ;;  %v219_v0 = vrot.slane %v218_v14, 1  ;;  %v252_v27 = vmax.f32 %v250_v8, %v251_v15 }
  0x8b   : > { %v259_v34 = vmax.f32 %v257_v16, %v258_v28  ;;  %v857_v35 = vpack.c.bf16 %v344_v23, %v342_v22 }
  0x8c   : > { %782 = vmatpush1.bf16.msra.mxu1 %v781_v30  ;;  %v349_v30 = vld [vmem:[#allocation4 + $0x1f8] sm:$0xff]  ;;  %v220_v32 = vadd.f32 %v219_v0, %v218_v14 }
  0x8d   : > { %846 = vmatpush1.bf16.msra.mxu0 %v845_v31  ;;  %784 = vmatprep.subr.bf16.mxu1 %v783_v36  ;;  %v793_v31 = vpack.c.bf16 %v409_v21, %v407_v20  ;;  %v795_v36 = vpack.c.bf16 %v414_v25, %v412_v24  ;;  %v859_v39 = vpack.c.bf16 %v349_v30, %v347_v29 }
  0x8e   : > { %848 = vmatprep.subr.bf16.mxu0 %v847_v37  ;;  %v411_v37 = vld [vmem:[#allocation4 + $0x3e0] sm:$0xff]  ;;  %v223_v42 = vcombine.low %v213_v26, %v220_v32  ;;  %v262_v43 = vcombine.low %v252_v27, %v259_v34 }
  0x8f   : > { %v797_v44 = vpack.c.bf16 %v413_v38, %v411_v37 }
  0x90   : > { %786 = vmatpush1.bf16.msra.mxu1 %v785_v50  ;;  %v230_v45 = vrot.slane %v223_v42, %v1302_v33  ;;  %v269_v46 = vrot.slane %v262_v43, %v1302_v33 }
  0x91   : > { %850 = vmatpush1.bf16.msra.mxu0 %v849_v59  ;;  %788 = vmatprep.subr.bf16.mxu1 %v787_v60 }
  0x92   : > { %852 = vmatprep.subr.bf16.mxu0 %v851_v61  ;;  %v237_v50 = vrot.slane %v230_v45, %v1302_v33  ;;  %v276_v51 = vrot.slane %v269_v46, %v1302_v33 }
  0x94   : > { %790 = vmatpush1.bf16.msra.mxu1 %v789_v10  ;;  %v239_v52 = vadd.f32 %v237_v50, %v202_v48  ;;  %v278_v53 = vmax.f32 %v245_v49, %v276_v51 }
  0x95   : > { %854 = vmatpush1.bf16.msra.mxu0 %v853_v17  ;;  %792 = vmatprep.subr.bf16.mxu1 %v791_v18 }
  0x96   : > { %856 = vmatprep.subr.bf16.mxu0 %v855_v19  ;;  %244 = vst.msk [vmem:[#allocation2] sm:$0x3] %vm1285_vm0, %v239_v52  ;;  %279 = vst.msk [vmem:[#allocation3] sm:$0x3] %vm1285_vm0, %v278_v53 }
  0x98   : > { %794 = vmatpush1.bf16.msra.mxu1 %v793_v31 }
  0x99   : > { %858 = vmatpush1.bf16.msra.mxu0 %v857_v35  ;;  %796 = vmatprep.subr.bf16.mxu1 %v795_v36 }
  0x9a   : > { %860 = vmatprep.subr.bf16.mxu0 %v859_v39 }
  0x9c   : > { %798 = vmatpush1.bf16.msra.mxu1 %v797_v44 }
  0x9d   : > { %862 = vmatpush1.bf16.msra.mxu0 %v861_v47  ;;  %v285_v56 = vld [vmem:[#allocation3] sm:$0x3]  ;;  %v283_v57 = vld [vmem:[#allocation2] sm:$0x3] }
  0x9e   : > { %v419_v58 = vrot.slane %v285_v56, %v418_v54  ;;  %v423_v59 = vrot.slane %v285_v56, %v422_v55  ;;  %v284_v60 = vmul.f32 0.25, %v283_v57 }
  0xa0   : > { %490 = vmatprep.mubr.f32.mxu1 %v423_v59  ;;  %v505_v61 = vrot.slane %v284_v60, %v422_v55  ;;  %v501_v62 = vrot.slane %v284_v60, %v418_v54 }
  0xa1   : > { %491 = vmatmul.mubr.f32.vlgmr.msra.gmra.mrb[0].mxu1 %v419_v58 }
  0xa2   : > { %572 = vmatprep.mubr.f32.mxu0 %v505_v61 }
  0xa3   : > { %573 = vmatmul.mubr.f32.vlgmr.msra.gmra.mrb[0].mxu0 %v501_v62 }
 0x174   : > { %v492_v63 = vpop.f32.mrb[0].mxu1 }
 0x175   : > { %v494_v2 = vpop.f32.mrb[1].mxu1 }
 0x176   : > { %v574_v3 = vpop.f32.mrb[0].mxu0 }
 0x177   : > { %v575_v4 = vadd.f32 %v574_v3, %v492_v63  ;;  %v576_v5 = vpop.f32.mrb[1].mxu0 }
 0x178   : > { %v577_v6 = vadd.f32 %v576_v5, %v494_v2 }
 0x179   : > { %v579_v7 = vsub.f32 0.0, %v575_v4 }
 0x17a   : > { %v580_v8 = vsub.f32 0.0, %v577_v6 }
 0x17b   : > { %v581_v9 = vmul.f32 1.442695, %v579_v7 }
 0x17c   : > { %v583_v10 = vmul.f32 1.442695, %v580_v8 }
 0x17d   : > { %944 = vpow2.f32 %v581_v9 }
 0x17e   : > { %946 = vpow2.f32 %v583_v10 }
 0x187   : > { %v945_v11 = vpop.eup %944 }
 0x188   : > { %v947_v12 = vpop.eup %946  ;;  %v585_v13 = vadd.f32 1.0, %v945_v11 }
 0x189   : > { %v586_v14 = vadd.f32 1.0, %v947_v12 }
 0x18a   : > { %948 = vrcp.f32 %v585_v13 }
 0x18b   : > { %950 = vrcp.f32 %v586_v14 }
 0x194   : > { %v949_v15 = vpop.eup %948 }
 0x195   : > { %v951_v16 = vpop.eup %950 }
 0x196   : > { %v591_v17 = vcombine.low %v949_v15, %v951_v16 }
 0x198   : > { %v598_v18 = vrot.slane %v591_v17, %v1302_v33 }
 0x19a   : > { %v605_v19 = vrot.slane %v598_v18, %v1302_v33 }
 0x19c   : > { %607 = vst.msk [vmem:[%s190_s21] sm:$0x3] %vm1285_vm0, %v605_v19 }
 0x19d   : > { %1023 = shalt.err (!%p1020_p5)
}
 0x19e   : > { %s1024_s29 = scalar_lea.hbm %s1321_s16, 32  ;;  %s1028_s18 = scalar_lea.hbm %s1374_s2, 64 }
 0x19f   : > { %p1025_p9 = scmp.ne.s32.totalorder %s1321_s16, %s1024_s29  ;;  %p1029_p7 = scmp.lt.u32.totalorder %s1321_s16, %s1374_s2 }
 0x1a0   : > { %p1030_p3 = scmp.lt.u32.totalorder %s1028_s18, %s1024_s29  ;;  %p1032_p4 = scmp.lt.u32.totalorder %s1024_s29, %s1321_s16 }
 0x1a1   : > { %p1026_p1 = pnand %p1025_p9, %p1217_p10 }
 0x1a2   : > { %p1031_p13 = por %p1030_p3, %p1029_p7 }
 0x1a3   : > { %p1027_p2 = pneg %p1026_p1 }
 0x1a4   : > { %p1033_p6 = por %p1032_p4, %p1031_p13 }
 0x1a6   : > { %p1034_p8 = pnand %p1033_p6, %p1027_p2 }
 0x1a8   : > { %1037 = shalt.err (!%p1034_p8)
}
 0x1a9   : > { %871 = dma.vmem_to_hbm [thread:$0]  (%p1217_p10), %s1323_s4, 32, %s1321_s16, %s609_s12  }
 0x1aa PF: > { %s635_s15 = sand.u32 1, %s1076_s9   ;;  %p1394_p12 = scmp.ne.s32.totalorder %s1382_s20, 0 }
 0x1ab   : > { %p1395_p11 = scmp.ge.s32.totalorder %s1096_s14, 2  ;;  %s636_s17 = scalar_lea.sflag [#allocation6], %s635_s15 }
 0x1ad   : > { %p882_p0 = pnand %p1395_p11, %p1394_p12 }
 0x1af   : > { %1071 = dma.done.wait (!%p882_p0), %s636_s17, 32  }
 0x1b0   : > { %1073 = vsyncadd (!%p882_p0), %s636_s17, 4294967264  ;;  %s19_s14 = sadd.s32 1, %s1096_s14   ;;  %s1396_s9 = smov %s1080_s10 }
 0x1b1   : > { %p16_p5 = scmp.ge.s32.totalorder %s19_s14, 4   ;;  %s1397_s10 = smov %s1084_s11 }
 0x1b2   : > { %s1398_s11 = smov %s1226_s28  ;;  %s1399_s12 = smov %s1092_s13 }
 0x1b3   : > { %s1400_s13 = smov %s1402_s25  ;;  %18 = sbr.rel (!%p16_p5) target bundleno = 7 (0x7), region = 87 }
 0x1ba   :  { %641 = vsyncpa [#allocation5], 1 }
 0x1bb   :  { %643 = vsyncpa [#allocation5 + $0x1], 1 }
 0x1bc   :  { %644 = vsyncpa [#allocation8], 1 }
 0x1bd   :  { %646 = vsyncpa [#allocation8 + $0x1], 1 }
 0x1be   :  { %647 = vsyncpa [#allocation6], 1 }
 0x1bf   :  { %649 = vsyncpa [#allocation6 + $0x1], 1 }

</bundles_post_ra>
